<compile_context>
chip_gen: v7x
topology: tpu7x:2x2x1
jax: 0.10.0
libtpu: 0.0.40
codegen_flags: <defaults>
</compile_context>

<pallas_src>
import functools

import jax
import jax.numpy as jnp
from jax import lax
from jax.experimental import pallas as pl
from jax.experimental.pallas import tpu as pltpu

K = 4          # kernel_size
STRIDE = 2
PADDING = 1
EPS = 1e-5     # BatchNorm2d default eps
NPAR = 4       # 2x2 output-parity classes of the stride-2 transposed conv
NTAP = 4       # 2x2 input taps per output pixel


def _cdiv(a, b):
    return -(-a // b)


def _conv_stats_kernel(x_ref, w_ref, mask_ref, y_ref, stats_ref, *, wp):
    """Parity-decomposed ConvTranspose2d(4,2,1) tile + per-tile channel stats.

    x_ref    : (1, 1, Cin, TILE_S + 2*wp + 2)  haloed slab of the zero-padded
               input, flattened with row pitch wp = W + 2 (spatial on lanes)
    w_ref    : (NPAR, NTAP, Cout, Cin)         parity/tap-packed weights
    mask_ref : (1, TILE_S)                     1.0 on valid output lanes else 0.0
    y_ref    : (1, NPAR, Cout, TILE_S)         pre-BN conv output tile (lane-dense)
    stats_ref: (1, 1, 2, Cout)                 per-tile per-channel [sum, sumsq]
    """
    cout = w_ref.shape[2]
    ts = y_ref.shape[3]
    mask = mask_ref[...]                               # (1, TILE_S) f32

    # 9 statically shifted views (row offset r, col offset c in {0,1,2} of the
    # 2x2 window origin relative to the slab start).  Static lane slices only.
    xs = [[x_ref[0, 0, :, r * wp + c: r * wp + c + ts] for c in range(3)]
          for r in range(3)]                           # each (Cin, TILE_S)

    s = jnp.zeros((cout,), jnp.float32)
    ss = jnp.zeros((cout,), jnp.float32)
    for p in range(NPAR):                              # parity p = 2*ph + pw
        ph, pw = p // 2, p % 2
        acc = jnp.zeros((cout, ts), jnp.float32)
        for tap in range(NTAP):                        # tap = 2*dh + dw
            dh, dw = tap // 2, tap % 2
            acc = acc + jnp.dot(w_ref[p, tap], xs[ph + dh][pw + dw],
                                preferred_element_type=jnp.float32)
        acc = acc * mask                               # zero padded/garbage lanes
        y_ref[0, p, :, :] = acc.astype(y_ref.dtype)    # dense (Cout, TILE_S) store
        s = s + jnp.sum(acc, axis=1)                   # stats from exact f32 acc
        ss = ss + jnp.sum(acc * acc, axis=1)
    # Lane-dense stats store: last dim = Cout.
    stats_ref[0, 0, 0:1, :] = s.reshape(1, cout)
    stats_ref[0, 0, 1:2, :] = ss.reshape(1, cout)


@functools.partial(jax.jit, static_argnames=("matmul_dtype", "tile_s"))
def conv_trans_forward(x_nchw, w_t, bias, gamma, beta, *,
                       matmul_dtype=jnp.bfloat16, tile_s=512):
    """Conv_Trans.forward: ConvTranspose2d(4,2,1) + BatchNorm2d(batch stats) + ReLU.

    x_nchw : (N, Cin, H, W)
    w_t    : (Cin, Cout, K, K)   PyTorch ConvTranspose2d weight layout
    bias   : (Cout,)             cancels exactly under training-mode BN -> unused
    gamma, beta : (Cout,)        BatchNorm2d affine parameters
    returns: (N, Cout, 2H, 2W)   float32
    """
    del bias  # Exact cancellation: BN subtracts the per-channel batch mean.
              # TODO(synk): re-add the bias if BN=False or eval-mode running stats.
    N, Cin, H, W = x_nchw.shape
    Cout = w_t.shape[1]
    wp = W + 2                       # row pitch of the padded, flattened input
    s_out = H * wp                   # pitch-flattened output extent per parity

    # ---- tile geometry: lane-dense 128-multiples, padded spatial axis ----------
    tile_s = max(128, (int(tile_s) // 128) * 128)
    tile_s = min(tile_s, _cdiv(s_out, 128) * 128)
    n_tiles = _cdiv(s_out, tile_s)
    s_out_pad = n_tiles * tile_s
    halo = 2 * wp + 2                # max static shift used inside the kernel
    slab_w = tile_s + halo
    s_in = s_out_pad + halo

    # ---- glue: zero-pad, pitch-flatten, cut haloed per-tile slabs ---------------
    x_pad = jnp.pad(x_nchw, ((0, 0), (0, 0), (1, 1), (1, 1)))     # (N,Cin,H+2,W+2)
    x_flat = x_pad.reshape(N, Cin, (H + 2) * wp)
    x_flat = jnp.pad(x_flat, ((0, 0), (0, 0), (0, s_in - (H + 2) * wp)))
    x_flat = x_flat.astype(matmul_dtype)
    # Haloed slabs: ~(1 + halo/tile_s)x duplication (vs 16x for full im2col).
    x_tiles = jnp.stack(
        [x_flat[:, :, t * tile_s: t * tile_s + slab_w] for t in range(n_tiles)],
        axis=1)                                                   # (N,nt,Cin,slab_w)

    # ---- glue: parity/tap-packed weights (NPAR, NTAP, Cout, Cin) ----------------
    # Output pixel (2m+ph, 2n+pw) uses input rows m+ph+dh-1, cols n+pw+dw-1 with
    # kernel tap kh = 3-ph-2*dh, kw = 3-pw-2*dw (dh, dw in {0,1}).
    w_khkw = jnp.transpose(w_t, (2, 3, 1, 0))                     # (K,K,Cout,Cin)
    packed = []
    for ph in range(2):
        for pw in range(2):
            packed.append(jnp.stack(
                [w_khkw[3 - ph - 2 * dh, 3 - pw - 2 * dw]
                 for dh in range(2) for dw in range(2)], axis=0)) # (NTAP,Cout,Cin)
    w_packed = jnp.stack(packed, axis=0).astype(matmul_dtype)     # (NPAR,NTAP,Cout,Cin)

    # ---- glue: validity mask over the padded, pitch-flattened spatial axis ------
    idx = jnp.arange(s_out_pad, dtype=jnp.int32)
    mask = ((idx < s_out) & ((idx % wp) < W)).astype(jnp.float32).reshape(1, s_out_pad)

    bx = jnp.dtype(matmul_dtype).itemsize
    grid = (N, n_tiles)              # >= 2 steps for the demo -> megacore-shardable

    block_bytes = (Cin * slab_w * bx                      # haloed input slab
                   + NPAR * NTAP * Cout * Cin * bx        # packed weights
                   + tile_s * 4                           # mask
                   + NPAR * Cout * tile_s * bx            # conv-out tile
                   + 2 * Cout * 4)                        # stats tile
    scratch_bytes = 9 * Cin * tile_s * bx + NPAR * Cout * tile_s * 4
    vmem_limit = int(min(100 * 2**20,
                         max(32 * 2**20, 2 * block_bytes + scratch_bytes)))

    cost = pl.CostEstimate(
        flops=2 * N * NPAR * NTAP * Cout * Cin * s_out_pad,
        transcendentals=0,
        bytes_accessed=(N * n_tiles * Cin * slab_w * bx
                        + NPAR * NTAP * Cout * Cin * bx
                        + s_out_pad * 4
                        + N * NPAR * Cout * s_out_pad * bx
                        + N * n_tiles * 2 * Cout * 4))

    conv_out, stats = pl.pallas_call(
        functools.partial(_conv_stats_kernel, wp=wp),
        grid=grid,
        in_specs=[
            pl.BlockSpec((1, 1, Cin, slab_w), lambda n, t: (n, t, 0, 0)),
            # Constant block index -> fetched once and kept resident.
            pl.BlockSpec((NPAR, NTAP, Cout, Cin), lambda n, t: (0, 0, 0, 0)),
            pl.BlockSpec((1, tile_s), lambda n, t: (0, t)),
        ],
        out_specs=(
            pl.BlockSpec((1, NPAR, Cout, tile_s), lambda n, t: (n, 0, 0, t)),
            pl.BlockSpec((1, 1, 2, Cout), lambda n, t: (n, t, 0, 0)),
        ),
        out_shape=(
            jax.ShapeDtypeStruct((N, NPAR, Cout, s_out_pad), matmul_dtype),
            jax.ShapeDtypeStruct((N, n_tiles, 2, Cout), jnp.float32),
        ),
        compiler_params=pltpu.CompilerParams(
            dimension_semantics=("parallel", "parallel"),
            vmem_limit_bytes=vmem_limit),
        cost_estimate=cost,
    )(x_tiles, w_packed, mask)

    # ---- glue: BN statistics from exact f32 partials ----------------------------
    cnt = float(N * NPAR * H * W)                        # = N * OH * OW valid pixels
    mean = jnp.sum(stats[:, :, 0, :], axis=(0, 1)) / cnt           # (Cout,)
    # E[x^2]-E[x]^2 with >=0 clamp; fine in f32 for activation-scale data.
    var = jnp.maximum(jnp.sum(stats[:, :, 1, :], axis=(0, 1)) / cnt - mean * mean,
                      0.0)
    scale = gamma.astype(jnp.float32) * lax.rsqrt(var + EPS)
    shift = beta.astype(jnp.float32) - mean * scale

    # ---- glue: BN + ReLU fused into the depth-to-space transpose ----------------
    y = conv_out.astype(jnp.float32)
    y = jnp.maximum(y * scale[None, None, :, None] + shift[None, None, :, None], 0.0)
    y = y[:, :, :, :s_out].reshape(N, 2, 2, Cout, H, wp)[..., :W]  # drop pitch pad
    y = jnp.transpose(y, (0, 3, 4, 1, 5, 2))             # (N, Cout, m, ph, n, pw)
    return y.reshape(N, Cout, 2 * H, 2 * W)


def _reference(x_nchw, w_t, bias, gamma, beta):
    """Pure-JAX reference: ConvTranspose2d + training-mode BN + ReLU (NCHW)."""
    pad = K - 1 - PADDING
    w_oihw = jnp.flip(jnp.transpose(w_t, (1, 0, 2, 3)), axis=(2, 3))
    y = lax.conv_general_dilated(
        x_nchw, w_oihw, window_strides=(1, 1),
        padding=((pad, pad), (pad, pad)),
        lhs_dilation=(STRIDE, STRIDE),
        dimension_numbers=('NCHW', 'OIHW', 'NCHW'),
        precision=lax.Precision.HIGHEST)
    y = y + bias[None, :, None, None]
    mean = jnp.mean(y, axis=(0, 2, 3), keepdims=True)
    var = jnp.mean((y - mean) ** 2, axis=(0, 2, 3), keepdims=True)
    y = (y - mean) * lax.rsqrt(var + EPS) * gamma[None, :, None, None] \
        + beta[None, :, None, None]
    return jnp.maximum(y, 0.0)


if __name__ == "__main__":
    N, Cin, H, W, Cout = 2, 4, 16, 16, 8

    key = jax.random.PRNGKey(0)
    k1, k2, k3, k4, k5 = jax.random.split(key, 5)
    x = jax.random.normal(k1, (N, Cin, H, W), jnp.float32)
    w = jax.random.normal(k2, (Cin, Cout, K, K), jnp.float32) / jnp.sqrt(Cout * K * K)
    b = jax.random.normal(k3, (Cout,), jnp.float32) * 0.1
    gamma = 1.0 + 0.1 * jax.random.normal(k4, (Cout,), jnp.float32)
    beta = 0.1 * jax.random.normal(k5, (Cout,), jnp.float32)

    ref = jax.block_until_ready(_reference(x, w, b, gamma, beta))

    # f32 MXU operands + f32 intermediate storage: exact module semantics.
    out_f32 = jax.block_until_ready(
        conv_trans_forward(x, w, b, gamma, beta, matmul_dtype=jnp.float32))
    assert out_f32.shape == (N, Cout, 2 * H, 2 * W), out_f32.shape
    err = float(jnp.max(jnp.abs(out_f32 - ref)))
    if err > 2e-3:
        raise AssertionError(f"f32 mismatch vs reference: max abs err = {err}")

    # Default fast path: bf16 MXU operands + bf16 intermediate (f32 accumulation
    # and f32 BN math) -- the recommended configuration on v5e/v6e/v7x.
    out = jax.block_until_ready(conv_trans_forward(x, w, b, gamma, beta))
    assert out.shape == (N, Cout, 2 * H, 2 * W), out.shape
    err_bf16 = float(jnp.max(jnp.abs(out - ref)))
    if err_bf16 > 1e-1:
        raise AssertionError(f"bf16 mismatch vs reference: max abs err = {err_bf16}")

    print("KERNEL_OK")
</pallas_src>

<mosaic_0001>
module attributes {stable_mosaic.version = 11 : i64} {
  func.func @_conv_stats_kernel(%arg0: i32, %arg1: i32, %arg2: memref<1x1x4x422xf32, #tpu.memory_space<vmem>>, %arg3: memref<4x4x8x4xf32, #tpu.memory_space<vmem>>, %arg4: memref<1x384xf32, #tpu.memory_space<vmem>>, %arg5: memref<1x4x8x384xf32, #tpu.memory_space<vmem>>, %arg6: memref<1x1x2x8xf32, #tpu.memory_space<vmem>>) attributes {dimension_semantics = [#tpu.dimension_semantics<parallel>, #tpu.dimension_semantics<parallel>], iteration_bounds = array<i64: 2, 1>, scalar_prefetch = 0 : i64, scratch_operands = 0 : i64, tpu.core_type = #tpu.core_type<tc>, window_params = [{transform_indices = @transform_0, window_bounds = array<i64: 1, 1, 4, 422>}, {pipeline_mode = #tpu.pipeline_mode<synchronous>, transform_indices = @transform_1, window_bounds = array<i64: 4, 4, 8, 4>}, {transform_indices = @transform_2, window_bounds = array<i64: 1, 384>}, {transform_indices = @transform_3, window_bounds = array<i64: 1, 4, 8, 384>}, {transform_indices = @transform_4, window_bounds = array<i64: 1, 1, 2, 8>}]} {
    %c0 = arith.constant 0 : index
    %c0_0 = arith.constant 0 : index
    %0 = vector.load %arg4[%c0, %c0_0] : memref<1x384xf32, #tpu.memory_space<vmem>>, vector<1x384xf32>
    %c0_1 = arith.constant 0 : index
    %c0_2 = arith.constant 0 : index
    %c0_3 = arith.constant 0 : index
    %c0_4 = arith.constant 0 : index
    %1 = vector.load %arg2[%c0_1, %c0_2, %c0_3, %c0_4] : memref<1x1x4x422xf32, #tpu.memory_space<vmem>>, vector<1x1x4x384xf32>
    %2 = vector.shape_cast %1 : vector<1x1x4x384xf32> to vector<4x384xf32>
    %c0_5 = arith.constant 0 : index
    %c0_6 = arith.constant 0 : index
    %c0_7 = arith.constant 0 : index
    %c1 = arith.constant 1 : index
    %3 = vector.load %arg2[%c0_5, %c0_6, %c0_7, %c1] : memref<1x1x4x422xf32, #tpu.memory_space<vmem>>, vector<1x1x4x384xf32>
    %4 = vector.shape_cast %3 : vector<1x1x4x384xf32> to vector<4x384xf32>
    %c0_8 = arith.constant 0 : index
    %c0_9 = arith.constant 0 : index
    %c0_10 = arith.constant 0 : index
    %c2 = arith.constant 2 : index
    %5 = vector.load %arg2[%c0_8, %c0_9, %c0_10, %c2] : memref<1x1x4x422xf32, #tpu.memory_space<vmem>>, vector<1x1x4x384xf32>
    %6 = vector.shape_cast %5 : vector<1x1x4x384xf32> to vector<4x384xf32>
    %c0_11 = arith.constant 0 : index
    %c0_12 = arith.constant 0 : index
    %c0_13 = arith.constant 0 : index
    %c18 = arith.constant 18 : index
    %7 = vector.load %arg2[%c0_11, %c0_12, %c0_13, %c18] : memref<1x1x4x422xf32, #tpu.memory_space<vmem>>, vector<1x1x4x384xf32>
    %8 = vector.shape_cast %7 : vector<1x1x4x384xf32> to vector<4x384xf32>
    %c0_14 = arith.constant 0 : index
    %c0_15 = arith.constant 0 : index
    %c0_16 = arith.constant 0 : index
    %c19 = arith.constant 19 : index
    %9 = vector.load %arg2[%c0_14, %c0_15, %c0_16, %c19] : memref<1x1x4x422xf32, #tpu.memory_space<vmem>>, vector<1x1x4x384xf32>
    %10 = vector.shape_cast %9 : vector<1x1x4x384xf32> to vector<4x384xf32>
    %c0_17 = arith.constant 0 : index
    %c0_18 = arith.constant 0 : index
    %c0_19 = arith.constant 0 : index
    %c20 = arith.constant 20 : index
    %11 = vector.load %arg2[%c0_17, %c0_18, %c0_19, %c20] : memref<1x1x4x422xf32, #tpu.memory_space<vmem>>, vector<1x1x4x384xf32>
    %12 = vector.shape_cast %11 : vector<1x1x4x384xf32> to vector<4x384xf32>
    %c0_20 = arith.constant 0 : index
    %c0_21 = arith.constant 0 : index
    %c0_22 = arith.constant 0 : index
    %c36 = arith.constant 36 : index
    %13 = vector.load %arg2[%c0_20, %c0_21, %c0_22, %c36] : memref<1x1x4x422xf32, #tpu.memory_space<vmem>>, vector<1x1x4x384xf32>
    %14 = vector.shape_cast %13 : vector<1x1x4x384xf32> to vector<4x384xf32>
    %c0_23 = arith.constant 0 : index
    %c0_24 = arith.constant 0 : index
    %c0_25 = arith.constant 0 : index
    %c37 = arith.constant 37 : index
    %15 = vector.load %arg2[%c0_23, %c0_24, %c0_25, %c37] : memref<1x1x4x422xf32, #tpu.memory_space<vmem>>, vector<1x1x4x384xf32>
    %16 = vector.shape_cast %15 : vector<1x1x4x384xf32> to vector<4x384xf32>
    %c0_26 = arith.constant 0 : index
    %c0_27 = arith.constant 0 : index
    %c0_28 = arith.constant 0 : index
    %c38 = arith.constant 38 : index
    %17 = vector.load %arg2[%c0_26, %c0_27, %c0_28, %c38] : memref<1x1x4x422xf32, #tpu.memory_space<vmem>>, vector<1x1x4x384xf32>
    %18 = vector.shape_cast %17 : vector<1x1x4x384xf32> to vector<4x384xf32>
    %cst = arith.constant 0.000000e+00 : f32
    %19 = vector.broadcast %cst : f32 to vector<8xf32>
    %cst_29 = arith.constant 0.000000e+00 : f32
    %20 = vector.broadcast %cst_29 : f32 to vector<8xf32>
    %cst_30 = arith.constant 0.000000e+00 : f32
    %21 = vector.broadcast %cst_30 : f32 to vector<8x384xf32>
    %c0_31 = arith.constant 0 : index
    %c0_32 = arith.constant 0 : index
    %c0_33 = arith.constant 0 : index
    %c0_34 = arith.constant 0 : index
    %22 = vector.load %arg3[%c0_31, %c0_32, %c0_33, %c0_34] : memref<4x4x8x4xf32, #tpu.memory_space<vmem>>, vector<1x1x8x4xf32>
    %23 = vector.shape_cast %22 : vector<1x1x8x4xf32> to vector<8x4xf32>
    %cst_35 = arith.constant dense<0.000000e+00> : vector<8x384xf32>
    %24 = tpu.matmul %23, %2, %cst_35 {dimension_numbers = #tpu.dot_dimension_numbers<[1], [0], [0], [1], [0, 0, 1, 1], [], []>} : vector<8x4xf32>, vector<4x384xf32>, vector<8x384xf32> -> vector<8x384xf32>
    %25 = arith.addf %21, %24 : vector<8x384xf32>
    %c0_36 = arith.constant 0 : index
    %c1_37 = arith.constant 1 : index
    %c0_38 = arith.constant 0 : index
    %c0_39 = arith.constant 0 : index
    %26 = vector.load %arg3[%c0_36, %c1_37, %c0_38, %c0_39] : memref<4x4x8x4xf32, #tpu.memory_space<vmem>>, vector<1x1x8x4xf32>
    %27 = vector.shape_cast %26 : vector<1x1x8x4xf32> to vector<8x4xf32>
    %cst_40 = arith.constant dense<0.000000e+00> : vector<8x384xf32>
    %28 = tpu.matmul %27, %4, %cst_40 {dimension_numbers = #tpu.dot_dimension_numbers<[1], [0], [0], [1], [0, 0, 1, 1], [], []>} : vector<8x4xf32>, vector<4x384xf32>, vector<8x384xf32> -> vector<8x384xf32>
    %29 = arith.addf %25, %28 : vector<8x384xf32>
    %c0_41 = arith.constant 0 : index
    %c2_42 = arith.constant 2 : index
    %c0_43 = arith.constant 0 : index
    %c0_44 = arith.constant 0 : index
    %30 = vector.load %arg3[%c0_41, %c2_42, %c0_43, %c0_44] : memref<4x4x8x4xf32, #tpu.memory_space<vmem>>, vector<1x1x8x4xf32>
    %31 = vector.shape_cast %30 : vector<1x1x8x4xf32> to vector<8x4xf32>
    %cst_45 = arith.constant dense<0.000000e+00> : vector<8x384xf32>
    %32 = tpu.matmul %31, %8, %cst_45 {dimension_numbers = #tpu.dot_dimension_numbers<[1], [0], [0], [1], [0, 0, 1, 1], [], []>} : vector<8x4xf32>, vector<4x384xf32>, vector<8x384xf32> -> vector<8x384xf32>
    %33 = arith.addf %29, %32 : vector<8x384xf32>
    %c0_46 = arith.constant 0 : index
    %c3 = arith.constant 3 : index
    %c0_47 = arith.constant 0 : index
    %c0_48 = arith.constant 0 : index
    %34 = vector.load %arg3[%c0_46, %c3, %c0_47, %c0_48] : memref<4x4x8x4xf32, #tpu.memory_space<vmem>>, vector<1x1x8x4xf32>
    %35 = vector.shape_cast %34 : vector<1x1x8x4xf32> to vector<8x4xf32>
    %cst_49 = arith.constant dense<0.000000e+00> : vector<8x384xf32>
    %36 = tpu.matmul %35, %10, %cst_49 {dimension_numbers = #tpu.dot_dimension_numbers<[1], [0], [0], [1], [0, 0, 1, 1], [], []>} : vector<8x4xf32>, vector<4x384xf32>, vector<8x384xf32> -> vector<8x384xf32>
    %37 = arith.addf %33, %36 : vector<8x384xf32>
    %38 = vector.broadcast %0 : vector<1x384xf32> to vector<8x384xf32>
    %39 = arith.mulf %37, %38 : vector<8x384xf32>
    %c0_50 = arith.constant 0 : index
    %c0_51 = arith.constant 0 : index
    %c0_52 = arith.constant 0 : index
    %c0_53 = arith.constant 0 : index
    %40 = vector.load %arg5[%c0_50, %c0_51, %c0_52, %c0_53] : memref<1x4x8x384xf32, #tpu.memory_space<vmem>>, vector<1x1x8x384xf32>
    %41 = vector.shape_cast %40 : vector<1x1x8x384xf32> to vector<8x384xf32>
    %42 = vector.shape_cast %39 : vector<8x384xf32> to vector<1x1x8x384xf32>
    tpu.vector_store %arg5[%c0_50, %c0_51, %c0_52, %c0_53], %42 {strides = array<i32>} : memref<1x4x8x384xf32, #tpu.memory_space<vmem>>, vector<1x1x8x384xf32>,
    %cst_54 = arith.constant dense<0.000000e+00> : vector<8xf32>
    %43 = vector.multi_reduction <add>, %39, %cst_54 [1] : vector<8x384xf32> to vector<8xf32>
    %44 = arith.addf %19, %43 : vector<8xf32>
    %45 = arith.mulf %39, %39 : vector<8x384xf32>
    %cst_55 = arith.constant dense<0.000000e+00> : vector<8xf32>
    %46 = vector.multi_reduction <add>, %45, %cst_55 [1] : vector<8x384xf32> to vector<8xf32>
    %47 = arith.addf %20, %46 : vector<8xf32>
    %cst_56 = arith.constant 0.000000e+00 : f32
    %48 = vector.broadcast %cst_56 : f32 to vector<8x384xf32>
    %c1_57 = arith.constant 1 : index
    %c0_58 = arith.constant 0 : index
    %c0_59 = arith.constant 0 : index
    %c0_60 = arith.constant 0 : index
    %49 = vector.load %arg3[%c1_57, %c0_58, %c0_59, %c0_60] : memref<4x4x8x4xf32, #tpu.memory_space<vmem>>, vector<1x1x8x4xf32>
    %50 = vector.shape_cast %49 : vector<1x1x8x4xf32> to vector<8x4xf32>
    %cst_61 = arith.constant dense<0.000000e+00> : vector<8x384xf32>
    %51 = tpu.matmul %50, %4, %cst_61 {dimension_numbers = #tpu.dot_dimension_numbers<[1], [0], [0], [1], [0, 0, 1, 1], [], []>} : vector<8x4xf32>, vector<4x384xf32>, vector<8x384xf32> -> vector<8x384xf32>
    %52 = arith.addf %48, %51 : vector<8x384xf32>
    %c1_62 = arith.constant 1 : index
    %c1_63 = arith.constant 1 : index
    %c0_64 = arith.constant 0 : index
    %c0_65 = arith.constant 0 : index
    %53 = vector.load %arg3[%c1_62, %c1_63, %c0_64, %c0_65] : memref<4x4x8x4xf32, #tpu.memory_space<vmem>>, vector<1x1x8x4xf32>
    %54 = vector.shape_cast %53 : vector<1x1x8x4xf32> to vector<8x4xf32>
    %cst_66 = arith.constant dense<0.000000e+00> : vector<8x384xf32>
    %55 = tpu.matmul %54, %6, %cst_66 {dimension_numbers = #tpu.dot_dimension_numbers<[1], [0], [0], [1], [0, 0, 1, 1], [], []>} : vector<8x4xf32>, vector<4x384xf32>, vector<8x384xf32> -> vector<8x384xf32>
    %56 = arith.addf %52, %55 : vector<8x384xf32>
    %c1_67 = arith.constant 1 : index
    %c2_68 = arith.constant 2 : index
    %c0_69 = arith.constant 0 : index
    %c0_70 = arith.constant 0 : index
    %57 = vector.load %arg3[%c1_67, %c2_68, %c0_69, %c0_70] : memref<4x4x8x4xf32, #tpu.memory_space<vmem>>, vector<1x1x8x4xf32>
    %58 = vector.shape_cast %57 : vector<1x1x8x4xf32> to vector<8x4xf32>
    %cst_71 = arith.constant dense<0.000000e+00> : vector<8x384xf32>
    %59 = tpu.matmul %58, %10, %cst_71 {dimension_numbers = #tpu.dot_dimension_numbers<[1], [0], [0], [1], [0, 0, 1, 1], [], []>} : vector<8x4xf32>, vector<4x384xf32>, vector<8x384xf32> -> vector<8x384xf32>
    %60 = arith.addf %56, %59 : vector<8x384xf32>
    %c1_72 = arith.constant 1 : index
    %c3_73 = arith.constant 3 : index
    %c0_74 = arith.constant 0 : index
    %c0_75 = arith.constant 0 : index
    %61 = vector.load %arg3[%c1_72, %c3_73, %c0_74, %c0_75] : memref<4x4x8x4xf32, #tpu.memory_space<vmem>>, vector<1x1x8x4xf32>
    %62 = vector.shape_cast %61 : vector<1x1x8x4xf32> to vector<8x4xf32>
    %cst_76 = arith.constant dense<0.000000e+00> : vector<8x384xf32>
    %63 = tpu.matmul %62, %12, %cst_76 {dimension_numbers = #tpu.dot_dimension_numbers<[1], [0], [0], [1], [0, 0, 1, 1], [], []>} : vector<8x4xf32>, vector<4x384xf32>, vector<8x384xf32> -> vector<8x384xf32>
    %64 = arith.addf %60, %63 : vector<8x384xf32>
    %65 = vector.broadcast %0 : vector<1x384xf32> to vector<8x384xf32>
    %66 = arith.mulf %64, %65 : vector<8x384xf32>
    %c0_77 = arith.constant 0 : index
    %c1_78 = arith.constant 1 : index
    %c0_79 = arith.constant 0 : index
    %c0_80 = arith.constant 0 : index
    %67 = vector.load %arg5[%c0_77, %c1_78, %c0_79, %c0_80] : memref<1x4x8x384xf32, #tpu.memory_space<vmem>>, vector<1x1x8x384xf32>
    %68 = vector.shape_cast %67 : vector<1x1x8x384xf32> to vector<8x384xf32>
    %69 = vector.shape_cast %66 : vector<8x384xf32> to vector<1x1x8x384xf32>
    tpu.vector_store %arg5[%c0_77, %c1_78, %c0_79, %c0_80], %69 {strides = array<i32>} : memref<1x4x8x384xf32, #tpu.memory_space<vmem>>, vector<1x1x8x384xf32>,
    %cst_81 = arith.constant dense<0.000000e+00> : vector<8xf32>
    %70 = vector.multi_reduction <add>, %66, %cst_81 [1] : vector<8x384xf32> to vector<8xf32>
    %71 = arith.addf %44, %70 : vector<8xf32>
    %72 = arith.mulf %66, %66 : vector<8x384xf32>
    %cst_82 = arith.constant dense<0.000000e+00> : vector<8xf32>
    %73 = vector.multi_reduction <add>, %72, %cst_82 [1] : vector<8x384xf32> to vector<8xf32>
    %74 = arith.addf %47, %73 : vector<8xf32>
    %cst_83 = arith.constant 0.000000e+00 : f32
    %75 = vector.broadcast %cst_83 : f32 to vector<8x384xf32>
    %c2_84 = arith.constant 2 : index
    %c0_85 = arith.constant 0 : index
    %c0_86 = arith.constant 0 : index
    %c0_87 = arith.constant 0 : index
    %76 = vector.load %arg3[%c2_84, %c0_85, %c0_86, %c0_87] : memref<4x4x8x4xf32, #tpu.memory_space<vmem>>, vector<1x1x8x4xf32>
    %77 = vector.shape_cast %76 : vector<1x1x8x4xf32> to vector<8x4xf32>
    %cst_88 = arith.constant dense<0.000000e+00> : vector<8x384xf32>
    %78 = tpu.matmul %77, %8, %cst_88 {dimension_numbers = #tpu.dot_dimension_numbers<[1], [0], [0], [1], [0, 0, 1, 1], [], []>} : vector<8x4xf32>, vector<4x384xf32>, vector<8x384xf32> -> vector<8x384xf32>
    %79 = arith.addf %75, %78 : vector<8x384xf32>
    %c2_89 = arith.constant 2 : index
    %c1_90 = arith.constant 1 : index
    %c0_91 = arith.constant 0 : index
    %c0_92 = arith.constant 0 : index
    %80 = vector.load %arg3[%c2_89, %c1_90, %c0_91, %c0_92] : memref<4x4x8x4xf32, #tpu.memory_space<vmem>>, vector<1x1x8x4xf32>
    %81 = vector.shape_cast %80 : vector<1x1x8x4xf32> to vector<8x4xf32>
    %cst_93 = arith.constant dense<0.000000e+00> : vector<8x384xf32>
    %82 = tpu.matmul %81, %10, %cst_93 {dimension_numbers = #tpu.dot_dimension_numbers<[1], [0], [0], [1], [0, 0, 1, 1], [], []>} : vector<8x4xf32>, vector<4x384xf32>, vector<8x384xf32> -> vector<8x384xf32>
    %83 = arith.addf %79, %82 : vector<8x384xf32>
    %c2_94 = arith.constant 2 : index
    %c2_95 = arith.constant 2 : index
    %c0_96 = arith.constant 0 : index
    %c0_97 = arith.constant 0 : index
    %84 = vector.load %arg3[%c2_94, %c2_95, %c0_96, %c0_97] : memref<4x4x8x4xf32, #tpu.memory_space<vmem>>, vector<1x1x8x4xf32>
    %85 = vector.shape_cast %84 : vector<1x1x8x4xf32> to vector<8x4xf32>
    %cst_98 = arith.constant dense<0.000000e+00> : vector<8x384xf32>
    %86 = tpu.matmul %85, %14, %cst_98 {dimension_numbers = #tpu.dot_dimension_numbers<[1], [0], [0], [1], [0, 0, 1, 1], [], []>} : vector<8x4xf32>, vector<4x384xf32>, vector<8x384xf32> -> vector<8x384xf32>
    %87 = arith.addf %83, %86 : vector<8x384xf32>
    %c2_99 = arith.constant 2 : index
    %c3_100 = arith.constant 3 : index
    %c0_101 = arith.constant 0 : index
    %c0_102 = arith.constant 0 : index
    %88 = vector.load %arg3[%c2_99, %c3_100, %c0_101, %c0_102] : memref<4x4x8x4xf32, #tpu.memory_space<vmem>>, vector<1x1x8x4xf32>
    %89 = vector.shape_cast %88 : vector<1x1x8x4xf32> to vector<8x4xf32>
    %cst_103 = arith.constant dense<0.000000e+00> : vector<8x384xf32>
    %90 = tpu.matmul %89, %16, %cst_103 {dimension_numbers = #tpu.dot_dimension_numbers<[1], [0], [0], [1], [0, 0, 1, 1], [], []>} : vector<8x4xf32>, vector<4x384xf32>, vector<8x384xf32> -> vector<8x384xf32>
    %91 = arith.addf %87, %90 : vector<8x384xf32>
    %92 = vector.broadcast %0 : vector<1x384xf32> to vector<8x384xf32>
    %93 = arith.mulf %91, %92 : vector<8x384xf32>
    %c0_104 = arith.constant 0 : index
    %c2_105 = arith.constant 2 : index
    %c0_106 = arith.constant 0 : index
    %c0_107 = arith.constant 0 : index
    %94 = vector.load %arg5[%c0_104, %c2_105, %c0_106, %c0_107] : memref<1x4x8x384xf32, #tpu.memory_space<vmem>>, vector<1x1x8x384xf32>
    %95 = vector.shape_cast %94 : vector<1x1x8x384xf32> to vector<8x384xf32>
    %96 = vector.shape_cast %93 : vector<8x384xf32> to vector<1x1x8x384xf32>
    tpu.vector_store %arg5[%c0_104, %c2_105, %c0_106, %c0_107], %96 {strides = array<i32>} : memref<1x4x8x384xf32, #tpu.memory_space<vmem>>, vector<1x1x8x384xf32>,
    %cst_108 = arith.constant dense<0.000000e+00> : vector<8xf32>
    %97 = vector.multi_reduction <add>, %93, %cst_108 [1] : vector<8x384xf32> to vector<8xf32>
    %98 = arith.addf %71, %97 : vector<8xf32>
    %99 = arith.mulf %93, %93 : vector<8x384xf32>
    %cst_109 = arith.constant dense<0.000000e+00> : vector<8xf32>
    %100 = vector.multi_reduction <add>, %99, %cst_109 [1] : vector<8x384xf32> to vector<8xf32>
    %101 = arith.addf %74, %100 : vector<8xf32>
    %cst_110 = arith.constant 0.000000e+00 : f32
    %102 = vector.broadcast %cst_110 : f32 to vector<8x384xf32>
    %c3_111 = arith.constant 3 : index
    %c0_112 = arith.constant 0 : index
    %c0_113 = arith.constant 0 : index
    %c0_114 = arith.constant 0 : index
    %103 = vector.load %arg3[%c3_111, %c0_112, %c0_113, %c0_114] : memref<4x4x8x4xf32, #tpu.memory_space<vmem>>, vector<1x1x8x4xf32>
    %104 = vector.shape_cast %103 : vector<1x1x8x4xf32> to vector<8x4xf32>
    %cst_115 = arith.constant dense<0.000000e+00> : vector<8x384xf32>
    %105 = tpu.matmul %104, %10, %cst_115 {dimension_numbers = #tpu.dot_dimension_numbers<[1], [0], [0], [1], [0, 0, 1, 1], [], []>} : vector<8x4xf32>, vector<4x384xf32>, vector<8x384xf32> -> vector<8x384xf32>
    %106 = arith.addf %102, %105 : vector<8x384xf32>
    %c3_116 = arith.constant 3 : index
    %c1_117 = arith.constant 1 : index
    %c0_118 = arith.constant 0 : index
    %c0_119 = arith.constant 0 : index
    %107 = vector.load %arg3[%c3_116, %c1_117, %c0_118, %c0_119] : memref<4x4x8x4xf32, #tpu.memory_space<vmem>>, vector<1x1x8x4xf32>
    %108 = vector.shape_cast %107 : vector<1x1x8x4xf32> to vector<8x4xf32>
    %cst_120 = arith.constant dense<0.000000e+00> : vector<8x384xf32>
    %109 = tpu.matmul %108, %12, %cst_120 {dimension_numbers = #tpu.dot_dimension_numbers<[1], [0], [0], [1], [0, 0, 1, 1], [], []>} : vector<8x4xf32>, vector<4x384xf32>, vector<8x384xf32> -> vector<8x384xf32>
    %110 = arith.addf %106, %109 : vector<8x384xf32>
    %c3_121 = arith.constant 3 : index
    %c2_122 = arith.constant 2 : index
    %c0_123 = arith.constant 0 : index
    %c0_124 = arith.constant 0 : index
    %111 = vector.load %arg3[%c3_121, %c2_122, %c0_123, %c0_124] : memref<4x4x8x4xf32, #tpu.memory_space<vmem>>, vector<1x1x8x4xf32>
    %112 = vector.shape_cast %111 : vector<1x1x8x4xf32> to vector<8x4xf32>
    %cst_125 = arith.constant dense<0.000000e+00> : vector<8x384xf32>
    %113 = tpu.matmul %112, %16, %cst_125 {dimension_numbers = #tpu.dot_dimension_numbers<[1], [0], [0], [1], [0, 0, 1, 1], [], []>} : vector<8x4xf32>, vector<4x384xf32>, vector<8x384xf32> -> vector<8x384xf32>
    %114 = arith.addf %110, %113 : vector<8x384xf32>
    %c3_126 = arith.constant 3 : index
    %c3_127 = arith.constant 3 : index
    %c0_128 = arith.constant 0 : index
    %c0_129 = arith.constant 0 : index
    %115 = vector.load %arg3[%c3_126, %c3_127, %c0_128, %c0_129] : memref<4x4x8x4xf32, #tpu.memory_space<vmem>>, vector<1x1x8x4xf32>
    %116 = vector.shape_cast %115 : vector<1x1x8x4xf32> to vector<8x4xf32>
    %cst_130 = arith.constant dense<0.000000e+00> : vector<8x384xf32>
    %117 = tpu.matmul %116, %18, %cst_130 {dimension_numbers = #tpu.dot_dimension_numbers<[1], [0], [0], [1], [0, 0, 1, 1], [], []>} : vector<8x4xf32>, vector<4x384xf32>, vector<8x384xf32> -> vector<8x384xf32>
    %118 = arith.addf %114, %117 : vector<8x384xf32>
    %119 = vector.broadcast %0 : vector<1x384xf32> to vector<8x384xf32>
    %120 = arith.mulf %118, %119 : vector<8x384xf32>
    %c0_131 = arith.constant 0 : index
    %c3_132 = arith.constant 3 : index
    %c0_133 = arith.constant 0 : index
    %c0_134 = arith.constant 0 : index
    %121 = vector.load %arg5[%c0_131, %c3_132, %c0_133, %c0_134] : memref<1x4x8x384xf32, #tpu.memory_space<vmem>>, vector<1x1x8x384xf32>
    %122 = vector.shape_cast %121 : vector<1x1x8x384xf32> to vector<8x384xf32>
    %123 = vector.shape_cast %120 : vector<8x384xf32> to vector<1x1x8x384xf32>
    tpu.vector_store %arg5[%c0_131, %c3_132, %c0_133, %c0_134], %123 {strides = array<i32>} : memref<1x4x8x384xf32, #tpu.memory_space<vmem>>, vector<1x1x8x384xf32>,
    %cst_135 = arith.constant dense<0.000000e+00> : vector<8xf32>
    %124 = vector.multi_reduction <add>, %120, %cst_135 [1] : vector<8x384xf32> to vector<8xf32>
    %125 = arith.addf %98, %124 : vector<8xf32>
    %126 = arith.mulf %120, %120 : vector<8x384xf32>
    %cst_136 = arith.constant dense<0.000000e+00> : vector<8xf32>
    %127 = vector.multi_reduction <add>, %126, %cst_136 [1] : vector<8x384xf32> to vector<8xf32>
    %128 = arith.addf %101, %127 : vector<8xf32>
    %129 = vector.shape_cast %125 : vector<8xf32> to vector<1x8xf32>
    %c0_137 = arith.constant 0 : index
    %c0_138 = arith.constant 0 : index
    %c0_139 = arith.constant 0 : index
    %c0_140 = arith.constant 0 : index
    %130 = vector.load %arg6[%c0_137, %c0_138, %c0_139, %c0_140] : memref<1x1x2x8xf32, #tpu.memory_space<vmem>>, vector<1x1x1x8xf32>
    %131 = vector.shape_cast %130 : vector<1x1x1x8xf32> to vector<1x8xf32>
    %132 = vector.shape_cast %129 : vector<1x8xf32> to vector<1x1x1x8xf32>
    tpu.vector_store %arg6[%c0_137, %c0_138, %c0_139, %c0_140], %132 {strides = array<i32>} : memref<1x1x2x8xf32, #tpu.memory_space<vmem>>, vector<1x1x1x8xf32>,
    %133 = vector.shape_cast %128 : vector<8xf32> to vector<1x8xf32>
    %c0_141 = arith.constant 0 : index
    %c0_142 = arith.constant 0 : index
    %c1_143 = arith.constant 1 : index
    %c0_144 = arith.constant 0 : index
    %134 = vector.load %arg6[%c0_141, %c0_142, %c1_143, %c0_144] : memref<1x1x2x8xf32, #tpu.memory_space<vmem>>, vector<1x1x1x8xf32>
    %135 = vector.shape_cast %134 : vector<1x1x1x8xf32> to vector<1x8xf32>
    %136 = vector.shape_cast %133 : vector<1x8xf32> to vector<1x1x1x8xf32>
    tpu.vector_store %arg6[%c0_141, %c0_142, %c1_143, %c0_144], %136 {strides = array<i32>} : memref<1x1x2x8xf32, #tpu.memory_space<vmem>>, vector<1x1x1x8xf32>,
    return
  }
  func.func @transform_0(%arg0: i32, %arg1: i32) -> (i32, i32, i32, i32) {
    %c0_i32 = arith.constant 0 : i32
    %c0_i32_0 = arith.constant 0 : i32
    %c0_i32_1 = arith.constant 0 : i32
    return %arg0, %arg1, %c0_i32, %c0_i32_0 : i32, i32, i32, i32
  }
  func.func @transform_1(%arg0: i32, %arg1: i32) -> (i32, i32, i32, i32) {
    %c0_i32 = arith.constant 0 : i32
    %c0_i32_0 = arith.constant 0 : i32
    %c0_i32_1 = arith.constant 0 : i32
    %c0_i32_2 = arith.constant 0 : i32
    %c0_i32_3 = arith.constant 0 : i32
    return %c0_i32, %c0_i32_0, %c0_i32_1, %c0_i32_2 : i32, i32, i32, i32
  }
  func.func @transform_2(%arg0: i32, %arg1: i32) -> (i32, i32) {
    %c0_i32 = arith.constant 0 : i32
    %c0_i32_0 = arith.constant 0 : i32
    return %c0_i32, %arg1 : i32, i32
  }
  func.func @transform_3(%arg0: i32, %arg1: i32) -> (i32, i32, i32, i32) {
    %c0_i32 = arith.constant 0 : i32
    %c0_i32_0 = arith.constant 0 : i32
    %c0_i32_1 = arith.constant 0 : i32
    return %arg0, %c0_i32, %c0_i32_0, %arg1 : i32, i32, i32, i32
  }
  func.func @transform_4(%arg0: i32, %arg1: i32) -> (i32, i32, i32, i32) {
    %c0_i32 = arith.constant 0 : i32
    %c0_i32_0 = arith.constant 0 : i32
    %c0_i32_1 = arith.constant 0 : i32
    return %arg0, %arg1, %c0_i32, %c0_i32_0 : i32, i32, i32, i32
  }
}

</mosaic_0001>

<bundles_post_ra>
// kernel: conv_trans_forward.1
= control target key start
LH: loop header
LB: loop body
LE: loop exit
PB: predicated region body
PF: predicated region fallthrough
CT: control target
= control target key end

     0   :  { %s3421_s15 = smov 0   ;;  %s3423_s16 = smov 0   ;;  %s3784_s0 = inlined_call_operand.vmem [shape: f32[2,1,4,422], index: 0, kind: input, shape index: {}]   ;;  %s3785_s1 = inlined_call_operand.vmem [shape: f32[4,4,8,4], index: 1, kind: input, shape index: {}]   ;;  %s3786_s2 = inlined_call_operand.vmem [shape: f32[1,384], index: 2, kind: input, shape index: {}]   ;;  %s3787_s3 = inlined_call_operand.vmem [shape: f32[2,4,8,384], index: 3, kind: output, shape index: {0}]   ;;  %s3788_s4 = inlined_call_operand.vmem [shape: f32[2,1,2,8], index: 4, kind: output, shape index: {1}]  }
   0x1   :  { %s3425_s17 = smov 0  }
   0x2 LB: > { %s27_s18 = sadd.s32 1, %s3380_s16  ;;  %p3053_p0 = scmp.ge.s32.totalorder %s3384_s17, 1  ;;  %s3384_s17 = sphi %s3425_s17, %s15_s17   ;;  %s3380_s16 = sphi %s3423_s16, %s3790_s16   ;;  %s3376_s15 = sphi %s3421_s15, %s3789_s15  }
   0x3   : > { %p29_p1 = scmp.ge.s32.totalorder %s27_s18, 2  ;;  %p197_p2 = scmp.lt.s32.totalorder %s3384_s17, 3 }
   0x5   : > { %s3792_s18 = smov (%p29_p1, %s27_s18), 0  ;;  %p198_p3 = pnand %p3053_p0, %p197_p2 }
   0x6   : > { %p242_p4 = scmp.lt.s32.totalorder (!%p198_p3), %s3376_s15, 1  ;;  %v3386_v0 = vmov (!%p198_p3), 0.0   ;;  %vm3387_vm0 = vmmov (!%p198_p3), 0   ;;  %s3388_s23 = smov (!%p198_p3), 127   ;;  %vm292_vm1 = vcmask (!%p198_p3), 1039360   ;;  %vm300_vm2 = vcmask (!%p198_p3), 1043456  }
   0x7   : > { %201 = sbr.rel (%p198_p3) target bundleno = 618 (0x26a), region = 32  ;;  %3197 = vmatprep.subr.mxu1 (!%p198_p3), %v3386_v0  ;;  %3199 = vmatprep.mubr.msk.f32.mxu1 (!%p198_p3), %vm3387_vm0, %v3386_v0  ;;  %s3389_s24 = smov (!%p198_p3), 110   ;;  %v3058_v9 = vld [vmem:[%s3785_s1 + $0x8] sm:$0xff] (!%p198_p3)  ;;  %vm296_vm3 = vcmask (!%p198_p3), 31744   ;;  %vm609_vm4 = vcmask (!%p198_p3), 900096   ;;  %v277_v19 = vld [vmem:[%s3785_s1] sm:$0xff] (!%p198_p3) }
   0x8   : > { %371 = vmatprep.mubr.f32.mxu0 (!%p198_p3), %v3386_v0  ;;  %s3390_s25 = smov (!%p198_p3), 109   ;;  %s3391_s26 = smov (!%p198_p3), 126   ;;  %vm776_vm5 = vcmask (!%p198_p3), 891904   ;;  %v3069_v27 = vld [vmem:[%s3785_s1 + $0x10] sm:$0xff] (!%p198_p3)  ;;  %vm980_vm6 = vcmask (!%p198_p3), 1031168   ;;  %v3075_v35 = vld [vmem:[%s3785_s1 + $0x18] sm:$0xff] (!%p198_p3) }
   0x9   : > { %s3392_s27 = smov (!%p198_p3), 108   ;;  %s3393_s28 = smov (!%p198_p3), 92   ;;  %v3082_v38 = vld [vmem:[%s3785_s1 + $0x28] sm:$0xff] (!%p198_p3)  ;;  %v3081_v39 = vld [vmem:[%s3785_s1 + $0x20] sm:$0xff] (!%p198_p3)  ;;  %vm1437_vm7 = vcmask (!%p198_p3), 883712   ;;  %v3093_v45 = vld [vmem:[%s3785_s1 + $0x30] sm:$0xff] (!%p198_p3) }
   0xa   : > { %s3394_s29 = smov (!%p198_p3), 91   ;;  %s3395_s30 = smov (!%p198_p3), 90   ;;  %v3099_v48 = vld [vmem:[%s3785_s1 + $0x38] sm:$0xff] (!%p198_p3)  ;;  %v3109_v51 = vld [vmem:[%s3785_s1 + $0x48] sm:$0xff] (!%p198_p3)  ;;  %vm1916_vm8 = vcmask (!%p198_p3), 752640   ;;  %v3108_v55 = vld [vmem:[%s3785_s1 + $0x40] sm:$0xff] (!%p198_p3) }
   0xb   : > { %vm2083_vm9 = vcmask (!%p198_p3), 744448   ;;  %v3120_v63 = vld [vmem:[%s3785_s1 + $0x50] sm:$0xff] (!%p198_p3)  ;;  %vm2711_vm10 = vcmask (!%p198_p3), 736256   ;;  %vm2896_vm11 = vcmask (!%p198_p3), 57344  }
   0xe   : > { %s3794_s15 = smov (!%p242_p4, %s3376_s15), 1 }
   0xf   : > { %s3164_s19 = sshll.u32 %s3794_s15, 4  ;;  %s3325_s21 = smul.u32 96, %s3794_s15 }
  0x10   : > { %s3449_s22 = scalar_lea.vmem %s3784_s0, %s3164_s19 }
  0x11   : > { %v3452_v1 = vld [vmem:[%s3449_s22] sm:$0xff]  ;;  %v276_v2 = vld [vmem:[%s3449_s22 + $0x8] sm:$0xff] }
  0x12   : > { %284 = vrot.lane.b32.xlu1 %v3452_v1, %s3388_s23  ;;  %v282_v3 = vcombine.high %v3452_v1, %v3452_v1  ;;  %v283_v4 = vcombine.high %v276_v2, %v276_v2  ;;  %v275_v14 = vld [vmem:[%s3449_s22 + $0x8] sm:$0xf] }
  0x14   : > { %286 = vrot.lane.b32.xlu0 %v282_v3, %s3388_s23 }
  0x16   : > { %290 = vrot.lane.b32.xlu1 %v283_v4, %s3388_s23 }
  0x18   : > { %288 = vrot.lane.b32.xlu0 %v276_v2, %s3388_s23 }
  0x1a   : > { %605 = vrot.lane.b32.xlu1 %v276_v2, %s3389_s24 }
  0x1c   : > { %603 = vrot.lane.b32.xlu0 %v282_v3, %s3389_s24 }
  0x1e   : > { %607 = vrot.lane.b32.xlu1 %v283_v4, %s3389_s24 }
  0x20   : > { %601 = vrot.lane.b32.xlu0 %v3452_v1, %s3389_s24  ;;  %s3747_s24 = scalar_lea.vmem %s3787_s3, %s3325_s21 }
  0x22   : > { %772 = vrot.lane.b32.xlu1 %v276_v2, %s3390_s25 }
  0x24   : > { %770 = vrot.lane.b32.xlu0 %v282_v3, %s3390_s25 }
  0x26   : > { %774 = vrot.lane.b32.xlu1 %v283_v4, %s3390_s25 }
  0x28   : > { %768 = vrot.lane.b32.xlu0 %v3452_v1, %s3390_s25  ;;  %s3057_s25 = sshll.u32 %s3794_s15, 1 }
  0x2a   : > { %976 = vrot.lane.b32.xlu1 %v276_v2, %s3391_s26 }
  0x2c   : > { %974 = vrot.lane.b32.xlu0 %v282_v3, %s3391_s26 }
  0x2e   : > { %978 = vrot.lane.b32.xlu1 %v283_v4, %s3391_s26 }
  0x30   : > { %972 = vrot.lane.b32.xlu0 %v3452_v1, %s3391_s26 }
  0x32   : > { %1433 = vrot.lane.b32.xlu1 %v276_v2, %s3392_s27 }
  0x34   : > { %1431 = vrot.lane.b32.xlu0 %v282_v3, %s3392_s27 }
  0x36   : > { %1435 = vrot.lane.b32.xlu1 %v283_v4, %s3392_s27 }
  0x38   : > { %1429 = vrot.lane.b32.xlu0 %v3452_v1, %s3392_s27 }
  0x3a   : > { %1912 = vrot.lane.b32.xlu1 %v276_v2, %s3393_s28 }
  0x3c   : > { %1910 = vrot.lane.b32.xlu0 %v282_v3, %s3393_s28 }
  0x3e   : > { %1914 = vrot.lane.b32.xlu1 %v283_v4, %s3393_s28 }
  0x40   : > { %1908 = vrot.lane.b32.xlu0 %v3452_v1, %s3393_s28  ;;  %s272_s28 = scalar_lea.vmem %s3788_s4, %s3057_s25 }
  0x42   : > { %2079 = vrot.lane.b32.xlu1 %v276_v2, %s3394_s29 }
  0x44   : > { %2077 = vrot.lane.b32.xlu0 %v282_v3, %s3394_s29 }
  0x46   : > { %2081 = vrot.lane.b32.xlu1 %v283_v4, %s3394_s29 }
  0x48   : > { %2075 = vrot.lane.b32.xlu0 %v3452_v1, %s3394_s29 }
  0x4a   : > { %2707 = vrot.lane.b32.xlu1 %v276_v2, %s3395_s30 }
  0x4c   : > { %2705 = vrot.lane.b32.xlu0 %v282_v3, %s3395_s30 }
  0x4e   : > { %2709 = vrot.lane.b32.xlu1 %v283_v4, %s3395_s30  ;;  %v3136_v4 = vld [vmem:[%s3785_s1 + $0x68] sm:$0xff] }
  0x50   : > { %2703 = vrot.lane.b32.xlu0 %v3452_v1, %s3395_s30 }
  0x84   : > { %v285_v5 = vpop.permute.xlu1 %284 }
  0x86   : > { %v287_v6 = vpop.permute.xlu0 %286 }
  0x87   : > { %v3476_v12 = vsel %vm292_vm1, %v285_v5, %v287_v6  ;;  %v3135_v5 = vld [vmem:[%s3785_s1 + $0x60] sm:$0xff] }
  0x88   : > { %v291_v7 = vpop.permute.xlu1 %290 }
  0x8a   : > { %v289_v8 = vpop.permute.xlu0 %288 }
  0x8b   : > { %v3468_v10 = vsel %vm292_vm1, %v287_v6, %v289_v8  ;;  %v3470_v11 = vsel %vm292_vm1, %v289_v8, %v291_v7 }
  0x8c   : > { %3059 = vmatprep.subr.msk.mxu0 %vm300_vm2, %v3468_v10  ;;  %3198 = vmatpush3.msk.msra.mxu1 %vm300_vm2, %v3470_v11  ;;  %v606_v13 = vpop.permute.xlu1 %605 }
  0x8d   : > { %3060 = vmatpush1.msk.msra.mxu0 %vm300_vm2, %v3476_v12  ;;  %3200 = vmatmul.mubr.msk.f32.vlgmr.msra.gmra.mrb[0].mxu1 %vm296_vm3, %v3058_v9 }
  0x8e   : > { %3061 = vmatmul.mubr.msk.f32.vlgmr.msra.gmra.mrb[0].mxu0 %vm296_vm3, %v3058_v9  ;;  %3064 = vmatprep.subr.msk.mxu0 %vm300_vm2, %v282_v3  ;;  %v604_v15 = vpop.permute.xlu0 %603  ;;  %v3126_v3 = vld [vmem:[%s3785_s1 + $0x58] sm:$0xff] }
  0x8f   : > { %3065 = vmatpush1.msk.msra.mxu0 %vm300_vm2, %v3452_v1  ;;  %v3487_v16 = vsel %vm609_vm4, %v604_v15, %v606_v13  ;;  %3202 = vmatprep.subr.mxu1 %v3386_v0 }
  0x90   : > { %3203 = vmatpush3.msk.msra.mxu1 %vm300_vm2, %v275_v14  ;;  %3070 = vmatprep.subr.msk.mxu0 %vm300_vm2, %v3487_v16  ;;  %v608_v17 = vpop.permute.xlu1 %607  ;;  %v3153_v14 = vld [vmem:[%s3785_s1 + $0x78] sm:$0xff] }
  0x91   : > { %3204 = vmatprep.mubr.msk.f32.mxu1 %vm3387_vm0, %v3386_v0  ;;  %522 = vmatprep.mubr.f32.mxu0 %v3386_v0  ;;  %v3501_v20 = vsel %vm609_vm4, %v606_v13, %v608_v17 }
  0x92   : > { %v602_v18 = vpop.permute.xlu0 %601  ;;  %3207 = vmatprep.subr.mxu1 %v3386_v0 }
  0x93   : > { %v3504_v21 = vsel %vm609_vm4, %v602_v18, %v604_v15  ;;  %v934_v15 = vlaneseq  ;;  %v273_v18 = vld [vmem:[%s3786_s2] sm:$0x7] }
  0x94   : > { %v773_v22 = vpop.permute.xlu1 %772 }
  0x95   : > { %3205 = vmatmul.mubr.msk.f32.vlgmr.msra.gmra.mrb[0].mxu1 %vm296_vm3, %v277_v19 }
  0x96   : > { %3066 = vmatmul.mubr.msk.f32.vlgmr.msra.gmra.mrb[0].mxu0 %vm296_vm3, %v277_v19  ;;  %3208 = vmatpush3.msk.msra.mxu1 %vm300_vm2, %v3501_v20  ;;  %v771_v23 = vpop.permute.xlu0 %770 }
  0x97   : > { %3071 = vmatpush1.msk.msra.mxu0 %vm300_vm2, %v3504_v21  ;;  %v3513_v24 = vsel %vm776_vm5, %v771_v23, %v773_v22  ;;  %3209 = vmatprep.mubr.msk.f32.mxu1 %vm3387_vm0, %v3386_v0 }
  0x98   : > { %3076 = vmatprep.subr.msk.mxu0 %vm300_vm2, %v3513_v24  ;;  %v775_v25 = vpop.permute.xlu1 %774  ;;  %686 = vmatprep.mubr.f32.mxu0 %v3386_v0 }
  0x99   : > { %3212 = vmatprep.subr.mxu1 %v3386_v0  ;;  %v3525_v28 = vsel %vm776_vm5, %v773_v22, %v775_v25 }
  0x9a   : > { %v769_v26 = vpop.permute.xlu0 %768 }
  0x9b   : > { %v3528_v29 = vsel %vm776_vm5, %v769_v26, %v771_v23 }
  0x9c   : > { %v977_v30 = vpop.permute.xlu1 %976 }
  0x9d   : > { %3210 = vmatmul.mubr.msk.f32.vlgmr.msra.gmra.mrb[0].mxu1 %vm296_vm3, %v3069_v27 }
  0x9e   : > { %3072 = vmatmul.mubr.msk.f32.vlgmr.msra.gmra.mrb[0].mxu0 %vm296_vm3, %v3069_v27  ;;  %3213 = vmatpush3.msk.msra.mxu1 %vm300_vm2, %v3525_v28  ;;  %v975_v31 = vpop.permute.xlu0 %974 }
  0x9f   : > { %3077 = vmatpush1.msk.msra.mxu0 %vm300_vm2, %v3528_v29  ;;  %v982_v32 = vsel %vm980_vm6, %v975_v31, %v977_v30  ;;  %3214 = vmatprep.mubr.msk.f32.mxu1 %vm3387_vm0, %v3386_v0 }
  0xa0   : > { %3083 = vmatprep.subr.msk.mxu0 %vm300_vm2, %v982_v32  ;;  %v979_v33 = vpop.permute.xlu1 %978  ;;  %853 = vmatprep.mubr.f32.mxu0 %v3386_v0 }
  0xa1   : > { %3217 = vmatprep.subr.mxu1 %v3386_v0  ;;  %v983_v36 = vsel %vm980_vm6, %v977_v30, %v979_v33 }
  0xa2   : > { %v973_v34 = vpop.permute.xlu0 %972 }
  0xa3   : > { %v981_v37 = vsel %vm980_vm6, %v973_v34, %v975_v31 }
  0xa4   : > { %v1434_v40 = vpop.permute.xlu1 %1433 }
  0xa5   : > { %3215 = vmatmul.mubr.msk.f32.vlgmr.msra.gmra.mrb[0].mxu1 %vm296_vm3, %v3075_v35 }
  0xa6   : > { %3078 = vmatmul.mubr.msk.f32.vlgmr.msra.gmra.mrb[0].mxu0 %vm296_vm3, %v3075_v35  ;;  %3218 = vmatpush3.msk.msra.mxu1 %vm300_vm2, %v983_v36  ;;  %v1432_v41 = vpop.permute.xlu0 %1431 }
  0xa7   : > { %3084 = vmatpush1.msk.msra.mxu0 %vm300_vm2, %v981_v37  ;;  %3219 = vmatprep.mubr.msk.f32.mxu1 %vm3387_vm0, %v3386_v0  ;;  %v3577_v42 = vsel %vm1437_vm7, %v1432_v41, %v1434_v40 }
  0xa8   : > { %3088 = vmatprep.subr.msk.mxu0 %vm300_vm2, %v3468_v10  ;;  %3222 = vmatprep.subr.mxu1 %v3386_v0  ;;  %v1436_v43 = vpop.permute.xlu1 %1435 }
  0xa9   : > { %1057 = vmatprep.mubr.f32.mxu0 %v3386_v0  ;;  %3220 = vmatmul.mubr.msk.f32.vlgmr.msra.gmra.mrb[2].mxu1 %vm296_vm3, %v3082_v38  ;;  %v3594_v46 = vsel %vm1437_vm7, %v1434_v40, %v1436_v43 }
  0xaa   : > { %3223 = vmatpush3.msk.msra.mxu1 %vm300_vm2, %v3470_v11  ;;  %3085 = vmatmul.mubr.msk.f32.vlgmr.msra.gmra.mrb[2].mxu0 %vm296_vm3, %v3082_v38  ;;  %v1430_v44 = vpop.permute.xlu0 %1429  ;;  %v3147_v11 = vld [vmem:[%s3785_s1 + $0x70] sm:$0xff] }
  0xab   : > { %3089 = vmatpush1.msk.msra.mxu0 %vm300_vm2, %v3476_v12  ;;  %3224 = vmatprep.mubr.msk.f32.mxu1 %vm3387_vm0, %v3386_v0  ;;  %v3597_v47 = vsel %vm1437_vm7, %v1430_v44, %v1432_v41 }
  0xac   : > { %3094 = vmatprep.subr.msk.mxu0 %vm300_vm2, %v3513_v24  ;;  %3227 = vmatprep.subr.mxu1 %v3386_v0  ;;  %v1913_v49 = vpop.permute.xlu1 %1912 }
  0xad   : > { %1201 = vmatprep.mubr.f32.mxu0 %v3386_v0 }
  0xae   : > { %v1911_v50 = vpop.permute.xlu0 %1910 }
  0xaf   : > { %v1918_v53 = vsel %vm1916_vm8, %v1911_v50, %v1913_v49 }
  0xb0   : > { %v1915_v52 = vpop.permute.xlu1 %1914 }
  0xb1   : > { %3225 = vmatmul.mubr.msk.f32.vlgmr.msra.gmra.mrb[2].mxu1 %vm296_vm3, %v3081_v39  ;;  %v1919_v57 = vsel %vm1916_vm8, %v1913_v49, %v1915_v52 }
  0xb2   : > { %3228 = vmatpush3.msk.msra.mxu1 %vm300_vm2, %v3525_v28  ;;  %3090 = vmatmul.mubr.msk.f32.vlgmr.msra.gmra.mrb[2].mxu0 %vm296_vm3, %v3081_v39  ;;  %v1909_v54 = vpop.permute.xlu0 %1908 }
  0xb3   : > { %3095 = vmatpush1.msk.msra.mxu0 %vm300_vm2, %v3528_v29  ;;  %3229 = vmatprep.mubr.msk.f32.mxu1 %vm3387_vm0, %v3386_v0  ;;  %v1917_v59 = vsel %vm1916_vm8, %v1909_v54, %v1911_v50 }
  0xb4   : > { %3100 = vmatprep.subr.msk.mxu0 %vm300_vm2, %v3577_v42  ;;  %1347 = vmatprep.mubr.f32.mxu0 %v3386_v0  ;;  %v2080_v56 = vpop.permute.xlu1 %2079 }
  0xb5   : > { %3232 = vmatprep.subr.mxu1 %v3386_v0 }
  0xb6   : > { %v2078_v58 = vpop.permute.xlu0 %2077 }
  0xb7   : > { %v2085_v60 = vsel %vm2083_vm9, %v2078_v58, %v2080_v56 }
  0xb8   : > { %v2082_v61 = vpop.permute.xlu1 %2081 }
  0xb9   : > { %3230 = vmatmul.mubr.msk.f32.vlgmr.msra.gmra.mrb[2].mxu1 %vm296_vm3, %v3093_v45  ;;  %v2086_v1 = vsel %vm2083_vm9, %v2080_v56, %v2082_v61 }
  0xba   : > { %3096 = vmatmul.mubr.msk.f32.vlgmr.msra.gmra.mrb[2].mxu0 %vm296_vm3, %v3093_v45  ;;  %3233 = vmatpush3.msk.msra.mxu1 %vm300_vm2, %v3594_v46  ;;  %v2076_v62 = vpop.permute.xlu0 %2075 }
  0xbb   : > { %3101 = vmatpush1.msk.msra.mxu0 %vm300_vm2, %v3597_v47  ;;  %3234 = vmatprep.mubr.msk.f32.mxu1 %vm3387_vm0, %v3386_v0  ;;  %v2084_v2 = vsel %vm2083_vm9, %v2076_v62, %v2078_v58 }
  0xbc   : > { %3110 = vmatprep.subr.msk.mxu0 %vm300_vm2, %v3513_v24  ;;  %3237 = vmatprep.subr.mxu1 %v3386_v0  ;;  %v2708_v6 = vpop.permute.xlu1 %2707 }
  0xbd   : > { %1514 = vmatprep.mubr.f32.mxu0 %v3386_v0 }
  0xbe   : > { %v2706_v7 = vpop.permute.xlu0 %2705 }
  0xbf   : > { %v2713_v8 = vsel %vm2711_vm10, %v2706_v7, %v2708_v6 }
  0xc0   : > { %v2710_v9 = vpop.permute.xlu1 %2709 }
  0xc1   : > { %3235 = vmatmul.mubr.msk.f32.vlgmr.msra.gmra.mrb[2].mxu1 %vm296_vm3, %v3099_v48  ;;  %v2714_v12 = vsel %vm2711_vm10, %v2708_v6, %v2710_v9 }
  0xc2   : > { %3238 = vmatpush3.msk.msra.mxu1 %vm300_vm2, %v3525_v28  ;;  %3102 = vmatmul.mubr.msk.f32.vlgmr.msra.gmra.mrb[2].mxu0 %vm296_vm3, %v3099_v48  ;;  %v2704_v10 = vpop.permute.xlu0 %2703 }
  0xc3   : > { %3111 = vmatpush1.msk.msra.mxu0 %vm300_vm2, %v3528_v29  ;;  %3239 = vmatprep.mubr.msk.f32.mxu1 %vm3387_vm0, %v3386_v0  ;;  %v2712_v13 = vsel %vm2711_vm10, %v2704_v10, %v2706_v7 }
  0xc4   : > { %3115 = vmatprep.subr.msk.mxu0 %vm300_vm2, %v3487_v16  ;;  %3242 = vmatprep.subr.mxu1 %v3386_v0  ;;  %v3731_v16 = vshrl.u32 %v934_v15, 7 }
  0xc5   : > { %1685 = vmatprep.mubr.f32.mxu0 %v3386_v0  ;;  %3240 = vmatmul.mubr.msk.f32.vlgmr.msra.gmra.mrb[4].mxu1 %vm296_vm3, %v3109_v51 }
  0xc6   : > { %3243 = vmatpush3.msk.msra.mxu1 %vm300_vm2, %v3501_v20  ;;  %3112 = vmatmul.mubr.msk.f32.vlgmr.msra.gmra.mrb[4].mxu0 %vm296_vm3, %v3109_v51  ;;  %v944_v17 = vsub.s32 2, %v3731_v16  ;;  %v940_v19 = vsub.s32 1, %v3731_v16 }
  0xc7   : > { %3116 = vmatpush1.msk.msra.mxu0 %vm300_vm2, %v3504_v21  ;;  %3244 = vmatprep.mubr.msk.f32.mxu1 %vm3387_vm0, %v3386_v0 }
  0xc8   : > { %3121 = vmatprep.subr.msk.mxu0 %vm300_vm2, %v1918_v53  ;;  %1829 = vmatprep.mubr.f32.mxu0 %v3386_v0  ;;  %v945_v20 = vrot.slane %v273_v18, %v944_v17  ;;  %v3742_v22 = vrot.slane %v273_v18, %v940_v19 }
  0xc9   : > { %3247 = vmatprep.subr.mxu1 %v3386_v0 }
  0xcd   : > { %3245 = vmatmul.mubr.msk.f32.vlgmr.msra.gmra.mrb[4].mxu1 %vm296_vm3, %v3108_v55 }
  0xce   : > { %3117 = vmatmul.mubr.msk.f32.vlgmr.msra.gmra.mrb[4].mxu0 %vm296_vm3, %v3108_v55  ;;  %3248 = vmatpush3.msk.msra.mxu1 %vm300_vm2, %v1919_v57 }
  0xcf   : > { %3122 = vmatpush1.msk.msra.mxu0 %vm300_vm2, %v1917_v59  ;;  %3249 = vmatprep.mubr.msk.f32.mxu1 %vm3387_vm0, %v3386_v0 }
  0xd0   : > { %3127 = vmatprep.subr.msk.mxu0 %vm300_vm2, %v2085_v60  ;;  %1993 = vmatprep.mubr.f32.mxu0 %v3386_v0 }
  0xd1   : > { %3252 = vmatprep.subr.mxu1 %v3386_v0 }
  0xd5   : > { %3250 = vmatmul.mubr.msk.f32.vlgmr.msra.gmra.mrb[4].mxu1 %vm296_vm3, %v3120_v63 }
  0xd6   : > { %3123 = vmatmul.mubr.msk.f32.vlgmr.msra.gmra.mrb[4].mxu0 %vm296_vm3, %v3120_v63  ;;  %3253 = vmatpush3.msk.msra.mxu1 %vm300_vm2, %v2086_v1 }
  0xd7   : > { %3128 = vmatpush1.msk.msra.mxu0 %vm300_vm2, %v2084_v2  ;;  %3254 = vmatprep.mubr.msk.f32.mxu1 %vm3387_vm0, %v3386_v0 }
  0xd8   : > { %3137 = vmatprep.subr.msk.mxu0 %vm300_vm2, %v3577_v42  ;;  %3257 = vmatprep.subr.mxu1 %v3386_v0 }
  0xd9   : > { %2160 = vmatprep.mubr.f32.mxu0 %v3386_v0 }
  0xdd   : > { %3255 = vmatmul.mubr.msk.f32.vlgmr.msra.gmra.mrb[4].mxu1 %vm296_vm3, %v3126_v3 }
  0xde   : > { %3258 = vmatpush3.msk.msra.mxu1 %vm300_vm2, %v3594_v46  ;;  %3129 = vmatmul.mubr.msk.f32.vlgmr.msra.gmra.mrb[4].mxu0 %vm296_vm3, %v3126_v3 }
  0xdf   : > { %3138 = vmatpush1.msk.msra.mxu0 %vm300_vm2, %v3597_v47  ;;  %3259 = vmatprep.mubr.msk.f32.mxu1 %vm3387_vm0, %v3386_v0 }
  0xe0   : > { %3142 = vmatprep.subr.msk.mxu0 %vm300_vm2, %v3513_v24  ;;  %3262 = vmatprep.subr.mxu1 %v3386_v0 }
  0xe1   : > { %2331 = vmatprep.mubr.f32.mxu0 %v3386_v0  ;;  %3260 = vmatmul.mubr.msk.f32.vlgmr.msra.gmra.mrb[6].mxu1 %vm296_vm3, %v3136_v4 }
  0xe2   : > { %3263 = vmatpush3.msk.msra.mxu1 %vm300_vm2, %v3525_v28  ;;  %3139 = vmatmul.mubr.msk.f32.vlgmr.msra.gmra.mrb[6].mxu0 %vm296_vm3, %v3136_v4 }
  0xe3   : > { %3143 = vmatpush1.msk.msra.mxu0 %vm300_vm2, %v3528_v29  ;;  %3264 = vmatprep.mubr.msk.f32.mxu1 %vm3387_vm0, %v3386_v0 }
  0xe4   : > { %3148 = vmatprep.subr.msk.mxu0 %vm300_vm2, %v2085_v60  ;;  %3267 = vmatprep.subr.mxu1 %v3386_v0 }
  0xe5   : > { %2475 = vmatprep.mubr.f32.mxu0 %v3386_v0 }
  0xe9   : > { %3265 = vmatmul.mubr.msk.f32.vlgmr.msra.gmra.mrb[6].mxu1 %vm296_vm3, %v3135_v5 }
  0xea   : > { %3268 = vmatpush3.msk.msra.mxu1 %vm300_vm2, %v2086_v1  ;;  %3144 = vmatmul.mubr.msk.f32.vlgmr.msra.gmra.mrb[6].mxu0 %vm296_vm3, %v3135_v5 }
  0xeb   : > { %3149 = vmatpush1.msk.msra.mxu0 %vm300_vm2, %v2084_v2  ;;  %3269 = vmatprep.mubr.msk.f32.mxu1 %vm3387_vm0, %v3386_v0 }
  0xec   : > { %3154 = vmatprep.subr.msk.mxu0 %vm300_vm2, %v2713_v8  ;;  %2621 = vmatprep.mubr.f32.mxu0 %v3386_v0 }
  0xed   : > { %3272 = vmatprep.subr.mxu1 %v3386_v0 }
  0xf1   : > { %3270 = vmatmul.mubr.msk.f32.vlgmr.msra.gmra.mrb[6].mxu1 %vm296_vm3, %v3147_v11 }
  0xf2   : > { %3150 = vmatmul.mubr.msk.f32.vlgmr.msra.gmra.mrb[6].mxu0 %vm296_vm3, %v3147_v11  ;;  %3273 = vmatpush3.msk.msra.mxu1 %vm300_vm2, %v2714_v12 }
  0xf3   : > { %3155 = vmatpush1.msk.msra.mxu0 %vm300_vm2, %v2712_v13  ;;  %3274 = vmatprep.mubr.msk.f32.mxu1 %vm3387_vm0, %v3386_v0 }
  0xf4   : > { %2788 = vmatprep.mubr.f32.mxu0 %v3386_v0  ;;  %v936_v0 = vsub.s32 0, %v3731_v16 }
  0xf6   : > { %v3740_v21 = vrot.slane %v273_v18, %v936_v0 }
  0xf9   : > { %3275 = vmatmul.mubr.msk.f32.vlgmr.msra.gmra.mrb[6].mxu1 %vm296_vm3, %v3153_v14 }
  0xfa   : > { %3156 = vmatmul.mubr.msk.f32.vlgmr.msra.gmra.mrb[6].mxu0 %vm296_vm3, %v3153_v14 }
 0x178   : > { %v926_v23 = vpop.f32.mrb[0].mxu1 }
 0x179   : > { %v951_v24 = vmul.f32 %v945_v20, %v926_v23  ;;  %v855_v25 = vpop.f32.mrb[0].mxu0  ;;  %v3216_v26 = vpop.f32.mrb[1].mxu1 }
 0x17a   : > { %v949_v27 = vmul.f32 %v3740_v21, %v855_v25  ;;  %v857_v28 = vpop.f32.mrb[1].mxu0 }
 0x17b   : > { %954 = vst [vmem:[%s3747_s24 + $0x10] sm:$0xff] %v951_v24  ;;  %v950_v29 = vmul.f32 %v3742_v22, %v857_v28  ;;  %v962_v34 = vmul.f32 %v951_v24, %v951_v24 }
 0x17c   : > { %952 = vst [vmem:[%s3747_s24] sm:$0xff] %v949_v27  ;;  %v960_v30 = vmul.f32 %v949_v27, %v949_v27 }
 0x17d   : > { %953 = vst [vmem:[%s3747_s24 + $0x8] sm:$0xff] %v950_v29  ;;  %v961_v31 = vmul.f32 %v950_v29, %v950_v29  ;;  %v955_v32 = vadd.f32 %v950_v29, %v949_v27 }
 0x17f   : > { %v956_v33 = vadd.f32 %v955_v32, %v951_v24  ;;  %v963_v35 = vadd.f32 %v961_v31, %v960_v30 }
 0x181   : > { %957 = vadd.xlane.f32.xlu0 %v956_v33  ;;  %v964_v36 = vadd.f32 %v963_v35, %v962_v34 }
 0x183   : > { %965 = vadd.xlane.f32.xlu1 %v964_v36 }
 0x194   : > { %v1587_v37 = vpop.f32.mrb[2].mxu1 }
 0x195   : > { %v1596_v38 = vmul.f32 %v1587_v37, %v945_v20  ;;  %v1516_v39 = vpop.f32.mrb[2].mxu0  ;;  %v3236_v40 = vpop.f32.mrb[3].mxu1 }
 0x196   : > { %v1594_v41 = vmul.f32 %v1516_v39, %v3740_v21  ;;  %v1518_v42 = vpop.f32.mrb[3].mxu0 }
 0x197   : > { %3107 = vst [vmem:[%s3747_s24 + $0x28] sm:$0xff] %v1596_v38  ;;  %v1595_v43 = vmul.f32 %v1518_v42, %v3742_v22  ;;  %v1608_v48 = vmul.f32 %v1596_v38, %v1596_v38 }
 0x198   : > { %3105 = vst [vmem:[%s3747_s24 + $0x18] sm:$0xff] %v1594_v41  ;;  %v1606_v44 = vmul.f32 %v1594_v41, %v1594_v41 }
 0x199   : > { %3106 = vst [vmem:[%s3747_s24 + $0x20] sm:$0xff] %v1595_v43  ;;  %v1607_v45 = vmul.f32 %v1595_v43, %v1595_v43  ;;  %v1601_v46 = vadd.f32 %v1595_v43, %v1594_v41 }
 0x19b   : > { %v1602_v47 = vadd.f32 %v1601_v46, %v1596_v38  ;;  %v1609_v49 = vadd.f32 %v1607_v45, %v1606_v44 }
 0x19d   : > { %1603 = vadd.xlane.f32.xlu0 %v1602_v47  ;;  %v1610_v50 = vadd.f32 %v1609_v49, %v1608_v48 }
 0x1a1   : > { %1611 = vadd.xlane.f32.xlu0 %v1610_v50 }
 0x1b0   : > { %v2233_v51 = vpop.f32.mrb[4].mxu1 }
 0x1b1   : > { %v2242_v52 = vmul.f32 %v2233_v51, %v945_v20  ;;  %v2162_v53 = vpop.f32.mrb[4].mxu0  ;;  %v3256_v54 = vpop.f32.mrb[5].mxu1 }
 0x1b2   : > { %v2240_v55 = vmul.f32 %v2162_v53, %v3740_v21  ;;  %v2164_v56 = vpop.f32.mrb[5].mxu0 }
 0x1b3   : > { %3134 = vst [vmem:[%s3747_s24 + $0x40] sm:$0xff] %v2242_v52  ;;  %v2241_v57 = vmul.f32 %v2164_v56, %v3742_v22  ;;  %v2254_v62 = vmul.f32 %v2242_v52, %v2242_v52 }
 0x1b4   : > { %3132 = vst [vmem:[%s3747_s24 + $0x30] sm:$0xff] %v2240_v55  ;;  %v2252_v58 = vmul.f32 %v2240_v55, %v2240_v55 }
 0x1b5   : > { %3133 = vst [vmem:[%s3747_s24 + $0x38] sm:$0xff] %v2241_v57  ;;  %v2253_v59 = vmul.f32 %v2241_v57, %v2241_v57  ;;  %v2247_v60 = vadd.f32 %v2241_v57, %v2240_v55 }
 0x1b7   : > { %v2248_v61 = vadd.f32 %v2247_v60, %v2242_v52  ;;  %v2255_v63 = vadd.f32 %v2253_v59, %v2252_v58 }
 0x1b9   : > { %2249 = vadd.xlane.f32.xlu1 %v2248_v61  ;;  %v2256_v1 = vadd.f32 %v2255_v63, %v2254_v62 }
 0x1bb   : > { %2257 = vadd.xlane.f32.xlu0 %v2256_v1 }
 0x1cc   : > { %v2861_v2 = vpop.f32.mrb[6].mxu1 }
 0x1cd   : > { %v2870_v3 = vmul.f32 %v2861_v2, %v945_v20  ;;  %v2790_v4 = vpop.f32.mrb[6].mxu0  ;;  %v3276_v5 = vpop.f32.mrb[7].mxu1 }
 0x1ce   : > { %v2868_v6 = vmul.f32 %v2790_v4, %v3740_v21  ;;  %v2792_v7 = vpop.f32.mrb[7].mxu0  ;;  %v2890_v21 = vand.u32 127, %v934_v15 }
 0x1cf   : > { %3161 = vst [vmem:[%s3747_s24 + $0x58] sm:$0xff] %v2870_v3  ;;  %v2869_v8 = vmul.f32 %v2792_v7, %v3742_v22  ;;  %v2882_v13 = vmul.f32 %v2870_v3, %v2870_v3 }
 0x1d0   : > { %3159 = vst [vmem:[%s3747_s24 + $0x48] sm:$0xff] %v2868_v6  ;;  %v2880_v9 = vmul.f32 %v2868_v6, %v2868_v6  ;;  %v2893_v27 = vsub.s32 %v2890_v21, %v3731_v16 }
 0x1d1   : > { %3160 = vst [vmem:[%s3747_s24 + $0x50] sm:$0xff] %v2869_v8  ;;  %v2881_v10 = vmul.f32 %v2869_v8, %v2869_v8  ;;  %v2875_v11 = vadd.f32 %v2869_v8, %v2868_v6 }
 0x1d3   : > { %v2876_v12 = vadd.f32 %v2875_v11, %v2870_v3  ;;  %v2883_v14 = vadd.f32 %v2881_v10, %v2880_v9 }
 0x1d5   : > { %2877 = vadd.xlane.f32.xlu1 %v2876_v12  ;;  %v2884_v17 = vadd.f32 %v2883_v14, %v2882_v13 }
 0x1d7   : > { %2885 = vadd.xlane.f32.xlu0 %v2884_v17 }
 0x20e   : > { %v958_v18 = vpop.xlane.xlu0 %957 }
 0x210   : > { %v966_v19 = vpop.xlane.xlu1 %965 }
 0x22a   : > { %v1604_v0 = vpop.xlane.xlu0 %1603 }
 0x22b   : > { %v1605_v22 = vadd.f32 %v1604_v0, %v958_v18 }
 0x22e   : > { %v1612_v20 = vpop.xlane.xlu0 %1611 }
 0x22f   : > { %v1613_v25 = vadd.f32 %v1612_v20, %v966_v19 }
 0x246   : > { %v2250_v23 = vpop.xlane.xlu1 %2249 }
 0x247   : > { %v2251_v26 = vadd.f32 %v2250_v23, %v1605_v22 }
 0x248   : > { %v2258_v24 = vpop.xlane.xlu0 %2257 }
 0x249   : > { %v2259_v29 = vadd.f32 %v2258_v24, %v1613_v25 }
 0x262   : > { %v2878_v28 = vpop.xlane.xlu1 %2877 }
 0x263   : > { %v2879_v30 = vadd.f32 %v2878_v28, %v2251_v26 }
 0x264   : > { %v2886_v31 = vpop.xlane.xlu0 %2885 }
 0x265   : > { %v2894_v32 = vrot.slane %v2879_v30, %v2893_v27  ;;  %v2887_v33 = vadd.f32 %v2886_v31, %v2259_v29 }
 0x267   : > { %2897 = vst.msk [vmem:[%s272_s28] sm:$0x1] %vm2896_vm11, %v2894_v32  ;;  %v2902_v15 = vrot.slane %v2887_v33, %v2893_v27 }
 0x269   : > { %2904 = vst.msk [vmem:[%s272_s28 + $0x1] sm:$0x1] %vm2896_vm11, %v2902_v15 }
 0x26a PF: > { %s15_s17 = sadd.s32 1, %s3384_s17   ;;  %s3789_s15 = smov %s3380_s16 }
 0x26b   : > { %p12_p5 = scmp.ge.s32.totalorder %s15_s17, 4   ;;  %s3790_s16 = smov %s3792_s18 }
 0x26d   :  { %14 = sbr.rel (!%p12_p5) target bundleno = 2 (0x2), region = 95 }

</bundles_post_ra>
